<compile_context>
chip_gen: v6e
topology: v6e:2x2x1
jax: 0.10.0
libtpu: 0.0.40
codegen_flags: <defaults>
</compile_context>

<pallas_src>
import functools

import jax
import jax.numpy as jnp
from jax import lax
from jax.experimental import pallas as pl
from jax.experimental.pallas import tpu as pltpu


def _round_up(x, m):
    return (x + m - 1) // m * m


_NEG = float(jnp.finfo(jnp.float32).min)


# ----------------------------------------------------------------------------
# Fused conv7x7/s2 (+ optional scale/bias/ReLU) + maxpool3x3/s2 kernel
# ----------------------------------------------------------------------------
def _stem_fused_kernel(p_ref, w_ref, *rest, TP, Wo, Qo, Wg, Cp,
                       apply_affine, relu, pad_last_row):
    """One grid step = TP pooled output rows of one image.

    p_ref : (2*TP, Wg, K) bf16  im2col patches for 2*TP conv rows; buffer col c
                                holds conv col c-1 (col 0 / cols > Wo are zero).
    w_ref : (K, Cp)       bf16  conv weights, Cout lane-padded to Cp.
    s/b   : (1, Cp)       f32   optional per-channel scale / bias (StemA path).
    o_ref : (TP, Qo, Cp)  f32   pooled output rows.
    ybuf  : (2*TP+1, Wg, Cp) f32 conv rows; row 0 = 1-row halo carried across
                                sequential row tiles (-inf at the top edge).
    vbuf  : (TP, Wg, Cp)  f32   vertical (row) max before the column max.
    """
    if apply_affine:
        s_ref, b_ref, o_ref, ybuf, vbuf = rest
    else:
        o_ref, ybuf, vbuf = rest

    j = pl.program_id(1)
    nj = pl.num_programs(1)
    K = p_ref.shape[-1]

    # ---- conv: one MXU matmul for the whole 2*TP-row slab (f32 accumulate) ----
    p = p_ref[...].reshape(2 * TP * Wg, K)
    y = jnp.dot(p, w_ref[...], preferred_element_type=jnp.float32)
    if apply_affine:
        y = y * s_ref[...] + b_ref[...]
    if relu:
        y = jnp.maximum(y, 0.0)
    ybuf[pl.ds(1, 2 * TP), :, :] = y.reshape(2 * TP, Wg, Cp)

    # ---- pool -inf padding via static VMEM fills ----
    @pl.when(j == 0)                                   # top edge halo row
    def _():
        ybuf[pl.ds(0, 1), :, :] = jnp.full((1, Wg, Cp), _NEG, jnp.float32)

    # left pool-pad column (buffer col 0) and right pad columns (> Wo)
    ybuf[:, pl.ds(0, 1), :] = jnp.full((2 * TP + 1, 1, Cp), _NEG, jnp.float32)
    if Wg > Wo + 1:
        ybuf[:, pl.ds(Wo + 1, Wg - Wo - 1), :] = jnp.full(
            (2 * TP + 1, Wg - Wo - 1, Cp), _NEG, jnp.float32)
    if pad_last_row:                                   # bottom edge (odd Ho only)
        @pl.when(j == nj - 1)
        def _():
            ybuf[pl.ds(2 * TP, 1), :, :] = jnp.full(
                (1, Wg, Cp), _NEG, jnp.float32)

    # ---- 3x3 / stride-2 max pool ----
    # vertical: pooled row t uses conv rows 2t-1, 2t, 2t+1  (ybuf rows 2t..2t+2)
    vbuf[...] = jnp.maximum(
        jnp.maximum(ybuf[pl.ds(0, TP, 2), :, :], ybuf[pl.ds(1, TP, 2), :, :]),
        ybuf[pl.ds(2, TP, 2), :, :])

    # carry this tile's last conv row as the next tile's top halo
    ybuf[pl.ds(0, 1), :, :] = ybuf[pl.ds(2 * TP, 1), :, :]

    # horizontal: pooled col q uses buffer cols 2q, 2q+1, 2q+2 (strided sublane reads)
    o_ref[...] = jnp.maximum(
        jnp.maximum(vbuf[:, pl.ds(0, Qo, 2), :], vbuf[:, pl.ds(1, Qo, 2), :]),
        vbuf[:, pl.ds(2, Qo, 2), :]).astype(o_ref.dtype)


def _stem_conv_pool(x_nhwc, conv_w, scale, bias, *, relu, apply_affine,
                    tp_max=8):
    """Fused conv7x7(s2,p3,bias=False) [-> scale/bias -> ReLU] -> maxpool(3,2,1).

    Returns (B, Po, Qo, Cp) f32 NHWC with Cp = Cout lane-padded to 128.
    """
    B, H, W, Cin = x_nhwc.shape
    Cout = conv_w.shape[0]
    Ho = (H + 2 * 3 - 7) // 2 + 1
    Wo = (W + 2 * 3 - 7) // 2 + 1
    Po = (Ho + 2 * 1 - 3) // 2 + 1
    Qo = (Wo + 2 * 1 - 3) // 2 + 1

    K = 49 * Cin                       # NOT padded to 128 (full-dim block)
    Cp = _round_up(Cout, 128)          # lane-dense output channels
    Hg = 2 * Po                        # conv rows consumed by the pool (>= Ho)
    Wg = _round_up(2 * Qo + 1, 8)      # 1 left pool-pad col + sublane-mult width

    # pooled-row tile: largest divisor of Po <= tp_max whose per-step VMEM
    # footprint stays comfortably inside v7x's 64 MiB per-TC VMEM.
    def step_bytes(tp):
        return (2 * (2 * tp) * Wg * K * 2          # patches block (dbl-buffered)
                + 2 * K * Cp * 2                   # weights
                + (2 * tp + 1) * Wg * Cp * 4       # ybuf scratch
                + tp * Wg * Cp * 4                 # vbuf scratch
                + 2 * tp * Qo * Cp * 4 * 2         # out block (dbl-buffered)
                + (2 * tp) * Wg * Cp * 4)          # epilogue temporaries

    TP = 1
    for t in range(min(tp_max, Po), 0, -1):
        if Po % t == 0 and step_bytes(t) <= 24 * 1024 * 1024:
            TP = t
            break
    NJ = Po // TP

    # --- glue-side im2col (HBM slab; TODO(synk): move in-kernel via row-tap DMA) ---
    xp = jnp.pad(x_nhwc.astype(jnp.bfloat16), ((0, 0), (3, 3), (3, 3), (0, 0)))
    taps = []
    for kh in range(7):
        for kw in range(7):
            taps.append(lax.slice(
                xp, (0, kh, kw, 0),
                (B, kh + 2 * (Ho - 1) + 1, kw + 2 * (Wo - 1) + 1, Cin),
                (1, 2, 2, 1)))
    patches = jnp.stack(taps, axis=3).reshape(B, Ho, Wo, K)
    # rows padded to Hg; one zero col on the left (pool pad) + right pad to Wg
    patches = jnp.pad(patches,
                      ((0, 0), (0, Hg - Ho), (1, Wg - Wo - 1), (0, 0)))

    w_mat = jnp.transpose(conv_w, (2, 3, 1, 0)).reshape(K, Cout)
    w_mat = jnp.pad(w_mat, ((0, 0), (0, Cp - Cout))).astype(jnp.bfloat16)

    operands = [patches, w_mat]
    in_specs = [
        pl.BlockSpec((None, 2 * TP, Wg, K), lambda b, j: (b, j, 0, 0)),
        pl.BlockSpec((K, Cp), lambda b, j: (0, 0)),
    ]
    if apply_affine:
        s_row = jnp.pad(scale.astype(jnp.float32), (0, Cp - Cout)).reshape(1, Cp)
        b_row = jnp.pad(bias.astype(jnp.float32), (0, Cp - Cout)).reshape(1, Cp)
        operands += [s_row, b_row]
        in_specs += [pl.BlockSpec((1, Cp), lambda b, j: (0, 0)),
                     pl.BlockSpec((1, Cp), lambda b, j: (0, 0))]

    kern = functools.partial(
        _stem_fused_kernel, TP=TP, Wo=Wo, Qo=Qo, Wg=Wg, Cp=Cp,
        apply_affine=apply_affine, relu=relu, pad_last_row=(Hg > Ho))

    cost = pl.CostEstimate(
        flops=2 * B * Hg * Wg * K * Cp,
        transcendentals=0,
        bytes_accessed=B * Hg * Wg * K * 2 + K * Cp * 2 + B * Po * Qo * Cp * 4)

    out = pl.pallas_call(
        kern,
        out_shape=jax.ShapeDtypeStruct((B, Po, Qo, Cp), jnp.float32),
        grid=(B, NJ),
        in_specs=in_specs,
        out_specs=pl.BlockSpec((None, TP, Qo, Cp), lambda b, j: (b, j, 0, 0)),
        scratch_shapes=[
            pltpu.VMEM((2 * TP + 1, Wg, Cp), jnp.float32),   # conv rows + halo
            pltpu.VMEM((TP, Wg, Cp), jnp.float32),           # vertical max
        ],
        compiler_params=pltpu.CompilerParams(
            # batch is independent (megacore); row tiles carry a halo -> sequential
            dimension_semantics=("parallel", "arbitrary"),
            vmem_limit_bytes=32 * 1024 * 1024),
        cost_estimate=cost,
    )(*operands)
    return out            # (B, Po, Qo, Cp) NHWC, channels lane-padded to Cp


# ----------------------------------------------------------------------------
# Stem forwards
# ----------------------------------------------------------------------------
def stem_forward(x_nchw, conv_w, scale=None, bias=None, *, relu=False,
                 return_nhwc_padded=False):
    apply_affine = scale is not None
    Cout = conv_w.shape[0]
    x = jnp.transpose(x_nchw, (0, 2, 3, 1))             # NCHW -> NHWC
    p = _stem_conv_pool(x, conv_w, scale, bias, relu=relu,
                        apply_affine=apply_affine)
    if return_nhwc_padded:
        return p    # (B, Po, Qo, Cp): the layout downstream TPU kernels want
    return jnp.transpose(p[..., :Cout], (0, 3, 1, 2))   # NHWC -> NCHW, drop pad


def stem_b_forward(x_nchw, conv_w, **kw):
    """StemB (the given spec): conv7x7(s2, p3, bias=False) -> MaxPool(3, 2, 1)."""
    return stem_forward(x_nchw, conv_w, **kw)


def stem_a_forward(x_nchw, conv_w, gamma, beta, running_mean, running_var,
                   eps=1e-5, **kw):
    """StemA variant: conv -> eval-mode BN (folded) -> ReLU -> MaxPool."""
    inv = gamma / jnp.sqrt(running_var + eps)
    return stem_forward(x_nchw, conv_w, inv, beta - running_mean * inv,
                        relu=True, **kw)


# ----------------------------------------------------------------------------
# Pure-JAX references (bf16 conv operands, f32 accumulation — same as the kernel)
# ----------------------------------------------------------------------------
def _conv_ref(x_nchw, conv_w):
    return lax.conv_general_dilated(
        x_nchw.astype(jnp.bfloat16), conv_w.astype(jnp.bfloat16),
        window_strides=(2, 2), padding=((3, 3), (3, 3)),
        dimension_numbers=("NCHW", "OIHW", "NCHW"),
        preferred_element_type=jnp.float32)


def _pool_ref(y):
    return lax.reduce_window(
        y, -jnp.inf, lax.max,
        window_dimensions=(1, 1, 3, 3), window_strides=(1, 1, 2, 2),
        padding=((0, 0), (0, 0), (1, 1), (1, 1)))


def stem_b_reference(x_nchw, conv_w):
    return _pool_ref(_conv_ref(x_nchw, conv_w))


def stem_a_reference(x_nchw, conv_w, gamma, beta, mean, var, eps=1e-5):
    y = _conv_ref(x_nchw, conv_w)
    inv = gamma / jnp.sqrt(var + eps)
    y = y * inv[None, :, None, None] + (beta - mean * inv)[None, :, None, None]
    y = jnp.maximum(y, 0.0)
    return _pool_ref(y)


if __name__ == "__main__":
    key = jax.random.PRNGKey(0)
    k_x, k_w, k_g, k_b, k_m, k_v = jax.random.split(key, 6)

    B, Cin, H, W = 2, 4, 16, 16
    Cout = 32

    x = jax.random.normal(k_x, (B, Cin, H, W), dtype=jnp.float32)
    conv_w = jax.random.normal(k_w, (Cout, Cin, 7, 7), dtype=jnp.float32) * 0.1

    # ---- StemB (the given spec): conv7x7(s2,p3,bias=False) -> maxpool(3,2,1) ----
    fwd_b = jax.jit(stem_b_forward)
    out_b = jax.block_until_ready(fwd_b(x, conv_w))
    ref_b = stem_b_reference(x, conv_w)
    assert out_b.shape == (B, Cout, 4, 4), out_b.shape
    assert jnp.allclose(out_b, ref_b, atol=1e-2, rtol=1e-2), float(
        jnp.max(jnp.abs(out_b - ref_b)))

    # ---- StemA-style variant (conv -> folded eval-BN -> ReLU -> pool) ----
    gamma = jax.random.uniform(k_g, (Cout,), jnp.float32, minval=0.5, maxval=1.5)
    beta = jax.random.normal(k_b, (Cout,), jnp.float32) * 0.1
    running_mean = jax.random.normal(k_m, (Cout,), jnp.float32) * 0.1
    running_var = jax.random.uniform(k_v, (Cout,), jnp.float32,
                                     minval=0.5, maxval=1.5)
    fwd_a = jax.jit(stem_a_forward)
    out_a = jax.block_until_ready(
        fwd_a(x, conv_w, gamma, beta, running_mean, running_var))
    ref_a = stem_a_reference(x, conv_w, gamma, beta, running_mean, running_var)
    assert out_a.shape == (B, Cout, 4, 4), out_a.shape
    assert jnp.allclose(out_a, ref_a, atol=1e-2, rtol=1e-2), float(
        jnp.max(jnp.abs(out_a - ref_a)))

    print("KERNEL_OK")
</pallas_src>

<mosaic_0001>
module attributes {stable_mosaic.version = 11 : i64} {
  func.func @_stem_fused_kernel(%arg0: i32, %arg1: i32, %arg2: memref<1x8x16x196xbf16, #tpu.memory_space<vmem>>, %arg3: memref<196x128xbf16, #tpu.memory_space<vmem>>, %arg4: memref<1x4x4x128xf32, #tpu.memory_space<vmem>>, %arg5: memref<9x16x128xf32, #tpu.memory_space<vmem>>, %arg6: memref<4x16x128xf32, #tpu.memory_space<vmem>>) attributes {dimension_semantics = [#tpu.dimension_semantics<parallel>, #tpu.dimension_semantics<arbitrary>], iteration_bounds = array<i64: 2, 1>, scalar_prefetch = 0 : i64, scratch_operands = 2 : i64, tpu.core_type = #tpu.core_type<tc>, window_params = [{transform_indices = @transform_0, window_bounds = array<i64: 1, 8, 16, 196>}, {pipeline_mode = #tpu.pipeline_mode<synchronous>, transform_indices = @transform_1, window_bounds = array<i64: 196, 128>}, {transform_indices = @transform_2, window_bounds = array<i64: 1, 4, 4, 128>}]} {
    %c0 = arith.constant 0 : index
    %c0_0 = arith.constant 0 : index
    %c0_1 = arith.constant 0 : index
    %c0_2 = arith.constant 0 : index
    %0 = vector.load %arg2[%c0, %c0_0, %c0_1, %c0_2] : memref<1x8x16x196xbf16, #tpu.memory_space<vmem>>, vector<1x8x16x196xbf16>
    %1 = vector.shape_cast %0 : vector<1x8x16x196xbf16> to vector<8x16x196xbf16>
    %2 = vector.shape_cast %1 : vector<8x16x196xbf16> to vector<128x196xbf16>
    %c0_3 = arith.constant 0 : index
    %c0_4 = arith.constant 0 : index
    %3 = vector.load %arg3[%c0_3, %c0_4] : memref<196x128xbf16, #tpu.memory_space<vmem>>, vector<196x128xbf16>
    %cst = arith.constant dense<0.000000e+00> : vector<128x128xf32>
    %4 = tpu.matmul %2, %3, %cst {dimension_numbers = #tpu.dot_dimension_numbers<[1], [0], [0], [1], [0, 0, 1, 1], [], []>} : vector<128x196xbf16>, vector<196x128xbf16>, vector<128x128xf32> -> vector<128x128xf32>
    %5 = vector.shape_cast %4 : vector<128x128xf32> to vector<8x16x128xf32>
    %c1 = arith.constant 1 : index
    %c0_5 = arith.constant 0 : index
    %c0_6 = arith.constant 0 : index
    %6 = vector.load %arg5[%c1, %c0_5, %c0_6] : memref<9x16x128xf32, #tpu.memory_space<vmem>>, vector<8x16x128xf32>
    tpu.vector_store %arg5[%c1, %c0_5, %c0_6], %5 {strides = array<i32>} : memref<9x16x128xf32, #tpu.memory_space<vmem>>, vector<8x16x128xf32>,
    %c0_i32 = arith.constant 0 : i32
    %7 = arith.cmpi eq, %arg1, %c0_i32 : i32
    %8 = arith.extui %7 : i1 to i32
    %c0_i32_7 = arith.constant 0 : i32
    %9 = arith.cmpi ne, %8, %c0_i32_7 : i32
    scf.if %9 {
      %cst_44 = arith.constant -3.40282347E+38 : f32
      %30 = vector.broadcast %cst_44 : f32 to vector<1x16x128xf32>
      %c0_45 = arith.constant 0 : index
      %c0_46 = arith.constant 0 : index
      %c0_47 = arith.constant 0 : index
      %31 = vector.load %arg5[%c0_45, %c0_46, %c0_47] : memref<9x16x128xf32, #tpu.memory_space<vmem>>, vector<1x16x128xf32>
      tpu.vector_store %arg5[%c0_45, %c0_46, %c0_47], %30 {strides = array<i32>} : memref<9x16x128xf32, #tpu.memory_space<vmem>>, vector<1x16x128xf32>,
    } else {
    }
    %cst_8 = arith.constant -3.40282347E+38 : f32
    %10 = vector.broadcast %cst_8 : f32 to vector<9x1x128xf32>
    %c0_9 = arith.constant 0 : index
    %c0_10 = arith.constant 0 : index
    %c0_11 = arith.constant 0 : index
    %11 = vector.load %arg5[%c0_9, %c0_10, %c0_11] : memref<9x16x128xf32, #tpu.memory_space<vmem>>, vector<9x1x128xf32>
    tpu.vector_store %arg5[%c0_9, %c0_10, %c0_11], %10 {strides = array<i32>} : memref<9x16x128xf32, #tpu.memory_space<vmem>>, vector<9x1x128xf32>,
    %cst_12 = arith.constant -3.40282347E+38 : f32
    %12 = vector.broadcast %cst_12 : f32 to vector<9x7x128xf32>
    %c0_13 = arith.constant 0 : index
    %c9 = arith.constant 9 : index
    %c0_14 = arith.constant 0 : index
    %13 = vector.load %arg5[%c0_13, %c9, %c0_14] : memref<9x16x128xf32, #tpu.memory_space<vmem>>, vector<9x7x128xf32>
    tpu.vector_store %arg5[%c0_13, %c9, %c0_14], %12 {strides = array<i32>} : memref<9x16x128xf32, #tpu.memory_space<vmem>>, vector<9x7x128xf32>,
    %c0_15 = arith.constant 0 : index
    %c0_16 = arith.constant 0 : index
    %c0_17 = arith.constant 0 : index
    %14 = tpu.strided_load %arg5[%c0_15, %c0_16, %c0_17] {strides = array<i32: 2, 1, 1>} : memref<9x16x128xf32, #tpu.memory_space<vmem>>, vector<4x16x128xf32>
    %c1_18 = arith.constant 1 : index
    %c0_19 = arith.constant 0 : index
    %c0_20 = arith.constant 0 : index
    %15 = tpu.strided_load %arg5[%c1_18, %c0_19, %c0_20] {strides = array<i32: 2, 1, 1>} : memref<9x16x128xf32, #tpu.memory_space<vmem>>, vector<4x16x128xf32>
    %16 = arith.maximumf %14, %15 : vector<4x16x128xf32>
    %c2 = arith.constant 2 : index
    %c0_21 = arith.constant 0 : index
    %c0_22 = arith.constant 0 : index
    %17 = tpu.strided_load %arg5[%c2, %c0_21, %c0_22] {strides = array<i32: 2, 1, 1>} : memref<9x16x128xf32, #tpu.memory_space<vmem>>, vector<4x16x128xf32>
    %18 = arith.maximumf %16, %17 : vector<4x16x128xf32>
    %c0_23 = arith.constant 0 : index
    %c0_24 = arith.constant 0 : index
    %c0_25 = arith.constant 0 : index
    %19 = vector.load %arg6[%c0_23, %c0_24, %c0_25] : memref<4x16x128xf32, #tpu.memory_space<vmem>>, vector<4x16x128xf32>
    tpu.vector_store %arg6[%c0_23, %c0_24, %c0_25], %18 {strides = array<i32>} : memref<4x16x128xf32, #tpu.memory_space<vmem>>, vector<4x16x128xf32>,
    %c8 = arith.constant 8 : index
    %c0_26 = arith.constant 0 : index
    %c0_27 = arith.constant 0 : index
    %20 = vector.load %arg5[%c8, %c0_26, %c0_27] : memref<9x16x128xf32, #tpu.memory_space<vmem>>, vector<1x16x128xf32>
    %c0_28 = arith.constant 0 : index
    %c0_29 = arith.constant 0 : index
    %c0_30 = arith.constant 0 : index
    %21 = vector.load %arg5[%c0_28, %c0_29, %c0_30] : memref<9x16x128xf32, #tpu.memory_space<vmem>>, vector<1x16x128xf32>
    tpu.vector_store %arg5[%c0_28, %c0_29, %c0_30], %20 {strides = array<i32>} : memref<9x16x128xf32, #tpu.memory_space<vmem>>, vector<1x16x128xf32>,
    %c0_31 = arith.constant 0 : index
    %c0_32 = arith.constant 0 : index
    %c0_33 = arith.constant 0 : index
    %22 = tpu.strided_load %arg6[%c0_31, %c0_32, %c0_33] {strides = array<i32: 1, 2, 1>} : memref<4x16x128xf32, #tpu.memory_space<vmem>>, vector<4x4x128xf32>
    %c0_34 = arith.constant 0 : index
    %c1_35 = arith.constant 1 : index
    %c0_36 = arith.constant 0 : index
    %23 = tpu.strided_load %arg6[%c0_34, %c1_35, %c0_36] {strides = array<i32: 1, 2, 1>} : memref<4x16x128xf32, #tpu.memory_space<vmem>>, vector<4x4x128xf32>
    %24 = arith.maximumf %22, %23 : vector<4x4x128xf32>
    %c0_37 = arith.constant 0 : index
    %c2_38 = arith.constant 2 : index
    %c0_39 = arith.constant 0 : index
    %25 = tpu.strided_load %arg6[%c0_37, %c2_38, %c0_39] {strides = array<i32: 1, 2, 1>} : memref<4x16x128xf32, #tpu.memory_space<vmem>>, vector<4x4x128xf32>
    %26 = arith.maximumf %24, %25 : vector<4x4x128xf32>
    %c0_40 = arith.constant 0 : index
    %c0_41 = arith.constant 0 : index
    %c0_42 = arith.constant 0 : index
    %c0_43 = arith.constant 0 : index
    %27 = vector.load %arg4[%c0_40, %c0_41, %c0_42, %c0_43] : memref<1x4x4x128xf32, #tpu.memory_space<vmem>>, vector<1x4x4x128xf32>
    %28 = vector.shape_cast %27 : vector<1x4x4x128xf32> to vector<4x4x128xf32>
    %29 = vector.shape_cast %26 : vector<4x4x128xf32> to vector<1x4x4x128xf32>
    tpu.vector_store %arg4[%c0_40, %c0_41, %c0_42, %c0_43], %29 {strides = array<i32>} : memref<1x4x4x128xf32, #tpu.memory_space<vmem>>, vector<1x4x4x128xf32>,
    return
  }
  func.func @transform_0(%arg0: i32, %arg1: i32) -> (i32, i32, i32, i32) {
    %c0_i32 = arith.constant 0 : i32
    %c0_i32_0 = arith.constant 0 : i32
    %c0_i32_1 = arith.constant 0 : i32
    return %arg0, %arg1, %c0_i32, %c0_i32_0 : i32, i32, i32, i32
  }
  func.func @transform_1(%arg0: i32, %arg1: i32) -> (i32, i32) {
    %c0_i32 = arith.constant 0 : i32
    %c0_i32_0 = arith.constant 0 : i32
    %c0_i32_1 = arith.constant 0 : i32
    return %c0_i32, %c0_i32_0 : i32, i32
  }
  func.func @transform_2(%arg0: i32, %arg1: i32) -> (i32, i32, i32, i32) {
    %c0_i32 = arith.constant 0 : i32
    %c0_i32_0 = arith.constant 0 : i32
    %c0_i32_1 = arith.constant 0 : i32
    return %arg0, %arg1, %c0_i32, %c0_i32_0 : i32, i32, i32, i32
  }
}

</mosaic_0001>

<bundles_post_ra>
// kernel: stem_b_forward.1
= control target key start
LH: loop header
LB: loop body
LE: loop exit
PB: predicated region body
PF: predicated region fallthrough
CT: control target
= control target key end

     0   :  { %s901_s9 = smov 0   ;;  %s903_s10 = smov 0   ;;  %s1055_s0 = inlined_call_operand.vmem [shape: bf16[2,8,16,196], index: 0, kind: input, shape index: {}]   ;;  %s1056_s1 = inlined_call_operand.vmem [shape: bf16[196,128], index: 1, kind: input, shape index: {}]   ;;  %s1057_s2 = inlined_call_operand.vmem [shape: f32[2,4,4,128], index: 2, kind: output, shape index: {}]  }
   0x1   :  { %s905_s11 = smov 0  }
   0x2 LB: > { %s24_s12 = sadd.s32 1, %s878_s10  ;;  %p725_p0 = scmp.ge.s32.totalorder %s882_s11, 1  ;;  %s882_s11 = sphi %s905_s11, %s12_s11   ;;  %s878_s10 = sphi %s903_s10, %s1059_s10   ;;  %s874_s9 = sphi %s901_s9, %s1058_s9  }
   0x3   : > { %p26_p1 = scmp.ge.s32.totalorder %s24_s12, 2  ;;  %p134_p2 = scmp.lt.s32.totalorder %s882_s11, 3 }
   0x5   : > { %s1061_s12 = smov (%p26_p1, %s24_s12), 0  ;;  %p135_p3 = pnand %p725_p0, %p134_p2 }
   0x6   : > { %p166_p4 = scmp.lt.s32.totalorder (!%p135_p3), %s874_s9, 1 }
   0x7   : > { %138 = sbr.rel (%p135_p3) target bundleno = 310 (0x136), region = 28 }
   0xc   : > { %v823_v0 = vld [vmem:[%s1056_s1 + $0x38] sm:$0xff]   ;;  %v884_v1 = vmov 0   ;;  %v824_v2 = vld [vmem:[%s1056_s1 + $0x30] sm:$0xff]   ;;  %s1063_s9 = smov (!%p166_p4, %s874_s9), 1  ;;  %v825_v3 = vld [vmem:[%s1056_s1 + $0x28] sm:$0xff]   ;;  %vm375_vm0 = vcmask 556032  }
   0xd   : > { %404 = vmatprep.subr.bf16.mxu0 %v884_v1  ;;  %771 = vmatprep.subr.bf16.mxu1 %v884_v1  ;;  %s769_s19 = sshll.u32 %s1063_s9, 7  ;;  %v826_v4 = vld [vmem:[%s1056_s1 + $0x20] sm:$0xff]   ;;  %v827_v6 = vld [vmem:[%s1056_s1 + $0x18] sm:$0xff]   ;;  %v828_v8 = vld [vmem:[%s1056_s1 + $0x10] sm:$0xff]   ;;  %vm400_vm1 = vcmask 1041408  }
   0xe   : > { %405 = vmatpush1.bf16.msra.mxu0 %v823_v0  ;;  %784 = vmatpush1.bf16.msra.mxu1 %v823_v0  ;;  %s943_s24 = scalar_lea.vmem %s1055_s0, %s769_s19  ;;  %v829_v9 = vld [vmem:[%s1056_s1 + $0x8] sm:$0xff]   ;;  %v830_v10 = vld [vmem:[%s1056_s1] sm:$0xff]   ;;  %v832_v13 = vld [vmem:[%s1056_s1 + $0x58] sm:$0xff]   ;;  %v885_v31 = vmov -3.4028235e+38   ;;  %s770_s19 = sshll.u32 %s1063_s9, 4 }
   0xf   : > { %406 = vmatprep.subr.bf16.mxu0 %v884_v1  ;;  %772 = vmatprep.subr.bf16.mxu1 %v884_v1  ;;  %v838_v5 = vld [vmem:[%s943_s24 + $0x4] ss:$8 sps:$4 sm:$0xff]   ;;  %v831_v11 = vld [vmem:[%s1056_s1 + $0x60] ss:$0 sps:$4 sm:$0x33]   ;;  %v833_v14 = vld [vmem:[%s1056_s1 + $0x50] sm:$0xff]   ;;  %s1040_s22 = scalar_lea.vmem %s1057_s2, %s770_s19 }
  0x10   : > { %v841_v7 = vld [vmem:[%s943_s24 + $0x44] ss:$8 sps:$4 sm:$0xff]   ;;  %759 = vmatprep.mubr.msk.bf16.mxu0 %vm375_vm0, %v838_v5  ;;  %v402_v12 = vsel %vm400_vm1, %v831_v11, 0  ;;  %v836_v17 = vld [vmem:[%s943_s24] ss:$8 sps:$4 sm:$0xff]   ;;  %522 = vst [vmem:[#allocation2] sm:$0xff] %v885_v31 }
  0x11   : > { %763 = vmatprep.mubr.msk.bf16.mxu1 %vm375_vm0, %v841_v7  ;;  %v834_v15 = vld [vmem:[%s1056_s1 + $0x48] sm:$0xff]   ;;  %v835_v16 = vld [vmem:[%s1056_s1 + $0x40] sm:$0xff]   ;;  %v842_v19 = vld [vmem:[%s943_s24 + $0x14] ss:$8 sps:$4 sm:$0xff]   ;;  %523 = vst [vmem:[#allocation2 + $0x8] sm:$0xff] %v885_v31 }
  0x12   : > { %407 = vmatpush1.bf16.msra.mxu0 %v824_v2  ;;  %785 = vmatpush1.bf16.msra.mxu1 %v824_v2  ;;  %v839_v18 = vld [vmem:[%s943_s24 + $0x40] ss:$8 sps:$4 sm:$0xff]   ;;  %v844_v20 = vld [vmem:[%s943_s24 + $0x54] ss:$8 sps:$4 sm:$0xff]   ;;  %v846_v21 = vld [vmem:[%s943_s24 + $0x10] ss:$8 sps:$4 sm:$0xff]  }
  0x13   : > { %408 = vmatprep.subr.bf16.mxu0 %v884_v1  ;;  %773 = vmatprep.subr.bf16.mxu1 %v884_v1  ;;  %v847_v22 = vld [vmem:[%s943_s24 + $0x50] ss:$8 sps:$4 sm:$0xff]   ;;  %v848_v23 = vld [vmem:[%s943_s24 + $0x24] ss:$8 sps:$4 sm:$0xff]   ;;  %v852_v25 = vld [vmem:[%s943_s24 + $0x20] ss:$8 sps:$4 sm:$0xff]  }
  0x14   : > { %v850_v24 = vld [vmem:[%s943_s24 + $0x64] ss:$8 sps:$4 sm:$0xff]   ;;  %v853_v26 = vld [vmem:[%s943_s24 + $0x60] ss:$8 sps:$4 sm:$0xff]   ;;  %v854_v27 = vld [vmem:[%s943_s24 + $0x34] ss:$8 sps:$4 sm:$0xff]  }
  0x15   : > { %v856_v28 = vld [vmem:[%s943_s24 + $0x74] ss:$8 sps:$4 sm:$0xff]   ;;  %v858_v29 = vld [vmem:[%s943_s24 + $0x30] ss:$8 sps:$4 sm:$0xff]   ;;  %524 = vst [vmem:[#allocation2] sm:$0x1] %v885_v31 }
  0x16   : > { %409 = vmatpush1.bf16.msra.mxu0 %v825_v3  ;;  %786 = vmatpush1.bf16.msra.mxu1 %v825_v3  ;;  %v859_v30 = vld [vmem:[%s943_s24 + $0x70] ss:$8 sps:$4 sm:$0xff]   ;;  %533 = vst [vmem:[#allocation2 + $0x9] sm:$0x7f] %v885_v31 }
  0x17   : > { %410 = vmatprep.subr.bf16.mxu0 %v884_v1  ;;  %774 = vmatprep.subr.bf16.mxu1 %v884_v1 }
  0x1a   : > { %411 = vmatpush1.bf16.msra.mxu0 %v826_v4  ;;  %787 = vmatpush1.bf16.msra.mxu1 %v826_v4 }
  0x1b   : > { %412 = vmatprep.subr.bf16.mxu0 %v884_v1  ;;  %775 = vmatprep.subr.bf16.mxu1 %v884_v1 }
  0x1c   : > { %v542_v46 = vld [vmem:[#allocation2] sm:$0xff] }
  0x1d   : > { %v543_v53 = vld [vmem:[#allocation2 + $0x8] sm:$0xff] }
  0x1e   : > { %413 = vmatpush1.bf16.msra.mxu0 %v827_v6  ;;  %788 = vmatpush1.bf16.msra.mxu1 %v827_v6 }
  0x1f   : > { %414 = vmatprep.subr.bf16.mxu0 %v884_v1  ;;  %776 = vmatprep.subr.bf16.mxu1 %v884_v1 }
  0x22   : > { %415 = vmatpush1.bf16.msra.mxu0 %v828_v8  ;;  %789 = vmatpush1.bf16.msra.mxu1 %v828_v8 }
  0x23   : > { %416 = vmatprep.subr.bf16.mxu0 %v884_v1  ;;  %777 = vmatprep.subr.bf16.mxu1 %v884_v1 }
  0x26   : > { %417 = vmatpush1.bf16.msra.mxu0 %v829_v9  ;;  %790 = vmatpush1.bf16.msra.mxu1 %v829_v9 }
  0x27   : > { %418 = vmatprep.subr.bf16.mxu0 %v884_v1  ;;  %778 = vmatprep.subr.bf16.mxu1 %v884_v1 }
  0x2a   : > { %419 = vmatpush1.bf16.msra.mxu0 %v830_v10  ;;  %791 = vmatpush1.bf16.msra.mxu1 %v830_v10 }
  0x2b   : > { %426 = vmatprep.subr.bf16.mxu0 %v884_v1  ;;  %779 = vmatprep.subr.bf16.mxu1 %v884_v1 }
  0x2e   : > { %427 = vmatpush2.bf16.msra.mxu0 %v402_v12  ;;  %792 = vmatpush2.bf16.msra.mxu1 %v402_v12 }
  0x2f   : > { %428 = vmatprep.subr.bf16.mxu0 %v884_v1  ;;  %780 = vmatprep.subr.bf16.mxu1 %v884_v1 }
  0x32   : > { %429 = vmatpush2.bf16.msra.mxu0 %v832_v13  ;;  %793 = vmatpush2.bf16.msra.mxu1 %v832_v13 }
  0x33   : > { %430 = vmatprep.subr.bf16.mxu0 %v884_v1  ;;  %781 = vmatprep.subr.bf16.mxu1 %v884_v1 }
  0x36   : > { %431 = vmatpush2.bf16.msra.mxu0 %v833_v14  ;;  %794 = vmatpush2.bf16.msra.mxu1 %v833_v14 }
  0x37   : > { %432 = vmatprep.subr.bf16.mxu0 %v884_v1  ;;  %782 = vmatprep.subr.bf16.mxu1 %v884_v1 }
  0x3a   : > { %433 = vmatpush2.bf16.msra.mxu0 %v834_v15  ;;  %795 = vmatpush2.bf16.msra.mxu1 %v834_v15 }
  0x3b   : > { %434 = vmatprep.subr.bf16.mxu0 %v884_v1  ;;  %783 = vmatprep.subr.bf16.mxu1 %v884_v1 }
  0x3e   : > { %435 = vmatpush2.bf16.msra.mxu0 %v835_v16  ;;  %796 = vmatpush2.bf16.msra.mxu1 %v835_v16 }
  0x41   : > { %437 = vmatmul.mubr.bf16.vlgmr.msra.gmra.mxu0 %v836_v17  ;;  %469 = vmatmul.mubr.bf16.vlgmr.msra.gmra.mxu1 %v839_v18 }
  0x42   : > { %760 = vmatprep.mubr.msk.bf16.mxu0 %vm375_vm0, %v842_v19  ;;  %764 = vmatprep.mubr.msk.bf16.mxu1 %vm375_vm0, %v844_v20 }
  0x49   : > { %445 = vmatmul.mubr.bf16.gmra.mxu0 %v846_v21  ;;  %477 = vmatmul.mubr.bf16.gmra.mxu1 %v847_v22 }
  0x4a   : > { %761 = vmatprep.mubr.msk.bf16.mxu0 %vm375_vm0, %v848_v23  ;;  %765 = vmatprep.mubr.msk.bf16.mxu1 %vm375_vm0, %v850_v24 }
  0x51   : > { %453 = vmatmul.mubr.bf16.gmra.mxu0 %v852_v25  ;;  %485 = vmatmul.mubr.bf16.gmra.mxu1 %v853_v26 }
  0x52   : > { %762 = vmatprep.mubr.msk.bf16.mxu0 %vm375_vm0, %v854_v27  ;;  %766 = vmatprep.mubr.msk.bf16.mxu1 %vm375_vm0, %v856_v28 }
  0x59   : > { %461 = vmatmul.mubr.bf16.gmra.mxu0 %v858_v29  ;;  %493 = vmatmul.mubr.bf16.gmra.mxu1 %v859_v30 }
 0x101   : > { %v438_v32 = vpop.f32.mrf.mxu0  ;;  %v470_v33 = vpop.f32.mrf.mxu1 }
 0x102   : > { %502 = vst [vmem:[#allocation2 + $0x10] sm:$0xff] %v438_v32  ;;  %510 = vst [vmem:[#allocation2 + $0x50] sm:$0xff] %v470_v33 }
 0x103   : > { %525 = vst [vmem:[#allocation2 + $0x10] sm:$0x1] %v885_v31  ;;  %529 = vst [vmem:[#allocation2 + $0x50] sm:$0x1] %v885_v31  ;;  %v440_v34 = vpop.f32.mrf.mxu0  ;;  %v472_v35 = vpop.f32.mrf.mxu1 }
 0x105   : > { %v441_v36 = vpop.f32.mrf.mxu0  ;;  %v473_v37 = vpop.f32.mrf.mxu1 }
 0x106   : > { %503 = vst [vmem:[#allocation2 + $0x18] sm:$0xff] %v441_v36  ;;  %511 = vst [vmem:[#allocation2 + $0x58] sm:$0xff] %v473_v37 }
 0x107   : > { %534 = vst [vmem:[#allocation2 + $0x19] sm:$0x7f] %v885_v31  ;;  %538 = vst [vmem:[#allocation2 + $0x59] sm:$0x7f] %v885_v31  ;;  %v443_v38 = vpop.f32.mrf.mxu0  ;;  %v475_v39 = vpop.f32.mrf.mxu1 }
 0x109   : > { %v446_v40 = vpop.f32.mrf.mxu0  ;;  %v478_v41 = vpop.f32.mrf.mxu1 }
 0x10a   : > { %504 = vst [vmem:[#allocation2 + $0x20] sm:$0xff] %v446_v40  ;;  %512 = vst [vmem:[#allocation2 + $0x60] sm:$0xff] %v478_v41  ;;  %v550_v47 = vld [vmem:[#allocation2 + $0x10] sm:$0xff] }
 0x10b   : > { %526 = vst [vmem:[#allocation2 + $0x20] sm:$0x1] %v885_v31  ;;  %530 = vst [vmem:[#allocation2 + $0x60] sm:$0x1] %v885_v31  ;;  %v448_v42 = vpop.f32.mrf.mxu0  ;;  %v480_v43 = vpop.f32.mrf.mxu1  ;;  %v558_v50 = vmax.f32 %v542_v46, %v550_v47  ;;  %v554_v17 = vld [vmem:[#allocation2 + $0x50] sm:$0xff] }
 0x10d   : > { %v449_v44 = vpop.f32.mrf.mxu0  ;;  %v481_v45 = vpop.f32.mrf.mxu1 }
 0x10e   : > { %505 = vst [vmem:[#allocation2 + $0x28] sm:$0xff] %v449_v44  ;;  %513 = vst [vmem:[#allocation2 + $0x68] sm:$0xff] %v481_v45  ;;  %v551_v54 = vld [vmem:[#allocation2 + $0x18] sm:$0xff] }
 0x10f   : > { %535 = vst [vmem:[#allocation2 + $0x29] sm:$0x7f] %v885_v31  ;;  %539 = vst [vmem:[#allocation2 + $0x69] sm:$0x7f] %v885_v31  ;;  %v451_v48 = vpop.f32.mrf.mxu0  ;;  %v483_v49 = vpop.f32.mrf.mxu1  ;;  %v559_v59 = vmax.f32 %v543_v53, %v551_v54  ;;  %v555_v32 = vld [vmem:[#allocation2 + $0x58] sm:$0xff] }
 0x111   : > { %v454_v51 = vpop.f32.mrf.mxu0  ;;  %v486_v52 = vpop.f32.mrf.mxu1 }
 0x112   : > { %v544_v55 = vld [vmem:[#allocation2 + $0x20] sm:$0xff]  ;;  %506 = vst [vmem:[#allocation2 + $0x30] sm:$0xff] %v454_v51  ;;  %514 = vst [vmem:[#allocation2 + $0x70] sm:$0xff] %v486_v52 }
 0x113   : > { %v575_v56 = vmax.f32 %v558_v50, %v544_v55  ;;  %527 = vst [vmem:[#allocation2 + $0x30] sm:$0x1] %v885_v31  ;;  %531 = vst [vmem:[#allocation2 + $0x70] sm:$0x1] %v885_v31  ;;  %v456_v57 = vpop.f32.mrf.mxu0  ;;  %v488_v58 = vpop.f32.mrf.mxu1  ;;  %v548_v15 = vld [vmem:[#allocation2 + $0x60] sm:$0xff] }
 0x115   : > { %583 = vst [vmem:[#allocation3] sm:$0xff] %v575_v56  ;;  %v457_v60 = vpop.f32.mrf.mxu0  ;;  %v489_v61 = vpop.f32.mrf.mxu1 }
 0x116   : > { %v545_v62 = vld [vmem:[#allocation2 + $0x28] sm:$0xff]  ;;  %507 = vst [vmem:[#allocation2 + $0x38] sm:$0xff] %v457_v60  ;;  %515 = vst [vmem:[#allocation2 + $0x78] sm:$0xff] %v489_v61 }
 0x117   : > { %v576_v63 = vmax.f32 %v559_v59, %v545_v62  ;;  %536 = vst [vmem:[#allocation2 + $0x39] sm:$0x7f] %v885_v31  ;;  %540 = vst [vmem:[#allocation2 + $0x79] sm:$0x7f] %v885_v31  ;;  %v459_v0 = vpop.f32.mrf.mxu0  ;;  %v491_v1 = vpop.f32.mrf.mxu1  ;;  %v549_v28 = vld [vmem:[#allocation2 + $0x68] sm:$0xff] }
 0x119   : > { %584 = vst [vmem:[#allocation3 + $0x8] sm:$0xff] %v576_v63  ;;  %v462_v2 = vpop.f32.mrf.mxu0  ;;  %v494_v3 = vpop.f32.mrf.mxu1 }
 0x11a   : > { %508 = vst [vmem:[#allocation2 + $0x40] sm:$0xff] %v462_v2  ;;  %516 = vst [vmem:[#allocation2 + $0x80] sm:$0xff] %v494_v3  ;;  %v552_v10 = vld [vmem:[#allocation2 + $0x30] sm:$0xff] }
 0x11b   : > { %528 = vst [vmem:[#allocation2 + $0x40] sm:$0x1] %v885_v31  ;;  %532 = vst [vmem:[#allocation2 + $0x80] sm:$0x1] %v885_v31  ;;  %v464_v4 = vpop.f32.mrf.mxu0  ;;  %v496_v5 = vpop.f32.mrf.mxu1  ;;  %v556_v11 = vld [vmem:[#allocation2 + $0x70] sm:$0xff]  ;;  %v560_v19 = vmax.f32 %v544_v55, %v552_v10 }
 0x11c   : > { %v596_v6 = vld [vmem:[#allocation3] ss:$2 sm:$0xf]  ;;  %v604_v7 = vld [vmem:[#allocation3 + $0x1] ss:$2 sm:$0xf]  ;;  %v564_v20 = vmax.f32 %v548_v15, %v556_v11 }
 0x11d   : > { %v465_v8 = vpop.f32.mrf.mxu0  ;;  %v497_v9 = vpop.f32.mrf.mxu1  ;;  %v611_v12 = vmax.f32 %v596_v6, %v604_v7 }
 0x11e   : > { %509 = vst [vmem:[#allocation2 + $0x48] sm:$0xff] %v465_v8  ;;  %517 = vst [vmem:[#allocation2 + $0x88] sm:$0xff] %v497_v9  ;;  %v553_v21 = vld [vmem:[#allocation2 + $0x38] sm:$0xff] }
 0x11f   : > { %537 = vst [vmem:[#allocation2 + $0x49] sm:$0x7f] %v885_v31  ;;  %541 = vst [vmem:[#allocation2 + $0x89] sm:$0x7f] %v885_v31  ;;  %v467_v13 = vpop.f32.mrf.mxu0  ;;  %v499_v14 = vpop.f32.mrf.mxu1  ;;  %v557_v22 = vld [vmem:[#allocation2 + $0x78] sm:$0xff]  ;;  %v561_v29 = vmax.f32 %v545_v62, %v553_v21 }
 0x120   : > { %v616_v16 = vld [vmem:[#allocation3 + $0x2] ss:$2 sm:$0xf]  ;;  %v565_v30 = vmax.f32 %v549_v28, %v557_v22 }
 0x121   : > { %v623_v18 = vmax.f32 %v611_v12, %v616_v16 }
 0x122   : > { %v546_v23 = vld [vmem:[#allocation2 + $0x40] sm:$0xff] }
 0x123   : > { %v573_v24 = vld [vmem:[#allocation2 + $0x80] sm:$0xff]  ;;  %627 = vst [vmem:[%s1040_s22] sm:$0xf] %v623_v18  ;;  %v562_v25 = vmax.f32 %v546_v23, %v554_v17  ;;  %v577_v26 = vmax.f32 %v560_v19, %v546_v23 }
 0x124   : > { %v581_v27 = vmax.f32 %v564_v20, %v573_v24  ;;  %594 = vst [vmem:[#allocation2] sm:$0xff] %v573_v24 }
 0x125   : > { %v579_v31 = vmax.f32 %v562_v25, %v548_v15  ;;  %585 = vst [vmem:[#allocation3 + $0x10] sm:$0xff] %v577_v26 }
 0x126   : > { %589 = vst [vmem:[#allocation3 + $0x30] sm:$0xff] %v581_v27  ;;  %v547_v33 = vld [vmem:[#allocation2 + $0x48] sm:$0xff] }
 0x127   : > { %v574_v34 = vld [vmem:[#allocation2 + $0x88] sm:$0xff]  ;;  %587 = vst [vmem:[#allocation3 + $0x20] sm:$0xff] %v579_v31  ;;  %v563_v35 = vmax.f32 %v547_v33, %v555_v32  ;;  %v578_v36 = vmax.f32 %v561_v29, %v547_v33 }
 0x128   : > { %v582_v37 = vmax.f32 %v565_v30, %v574_v34  ;;  %595 = vst [vmem:[#allocation2 + $0x8] sm:$0xff] %v574_v34 }
 0x129   : > { %v580_v38 = vmax.f32 %v563_v35, %v549_v28  ;;  %586 = vst [vmem:[#allocation3 + $0x18] sm:$0xff] %v578_v36 }
 0x12a   : > { %590 = vst [vmem:[#allocation3 + $0x38] sm:$0xff] %v582_v37 }
 0x12b   : > { %588 = vst [vmem:[#allocation3 + $0x28] sm:$0xff] %v580_v38 }
 0x12c   : > { %v598_v39 = vld [vmem:[#allocation3 + $0x10] ss:$2 sm:$0xf]  ;;  %v606_v40 = vld [vmem:[#allocation3 + $0x11] ss:$2 sm:$0xf] }
 0x12d   : > { %v602_v41 = vld [vmem:[#allocation3 + $0x30] ss:$2 sm:$0xf]  ;;  %v610_v42 = vld [vmem:[#allocation3 + $0x31] ss:$2 sm:$0xf]  ;;  %v612_v45 = vmax.f32 %v598_v39, %v606_v40 }
 0x12e   : > { %v600_v43 = vld [vmem:[#allocation3 + $0x20] ss:$2 sm:$0xf]  ;;  %v608_v44 = vld [vmem:[#allocation3 + $0x21] ss:$2 sm:$0xf]  ;;  %v614_v46 = vmax.f32 %v602_v41, %v610_v42 }
 0x12f   : > { %v613_v49 = vmax.f32 %v600_v43, %v608_v44 }
 0x130   : > { %v618_v47 = vld [vmem:[#allocation3 + $0x12] ss:$2 sm:$0xf] }
 0x131   : > { %v622_v48 = vld [vmem:[#allocation3 + $0x32] ss:$2 sm:$0xf]  ;;  %v624_v50 = vmax.f32 %v612_v45, %v618_v47 }
 0x132   : > { %v626_v51 = vmax.f32 %v614_v46, %v622_v48  ;;  %v620_v52 = vld [vmem:[#allocation3 + $0x22] ss:$2 sm:$0xf] }
 0x133   : > { %v625_v53 = vmax.f32 %v613_v49, %v620_v52  ;;  %628 = vst [vmem:[%s1040_s22 + $0x4] sm:$0xf] %v624_v50 }
 0x134   : > { %630 = vst [vmem:[%s1040_s22 + $0xc] sm:$0xf] %v626_v51 }
 0x135   : > { %629 = vst [vmem:[%s1040_s22 + $0x8] sm:$0xf] %v625_v53 }
 0x136 PF: > { %s12_s11 = sadd.s32 1, %s882_s11   ;;  %s1058_s9 = smov %s878_s10 }
 0x137   : > { %p9_p5 = scmp.ge.s32.totalorder %s12_s11, 4   ;;  %s1059_s10 = smov %s1061_s12 }
 0x139   :  { %11 = sbr.rel (!%p9_p5) target bundleno = 2 (0x2), region = 76 }

</bundles_post_ra>
